<compile_context>
chip_gen: v7x
topology: tpu7x:2x2x1
jax: 0.10.0
libtpu: 0.0.40
codegen_flags: <defaults>
</compile_context>

<pallas_src>
import jax
import jax.numpy as jnp
from jax.experimental import pallas as pl
from jax.experimental.pallas import tpu as pltpu

_LANE = 128
_NEG_BIG = -1e30  # "minus infinity" bias for padded class columns (no NaN risk)


def _round_up(n, m):
    return ((n + m - 1) // m) * m


def _mlp_logsoftmax_kernel(x_ref, w1_ref, b1_ref, w2_ref, b2_ref, o_ref):
    """One batch tile: lin1 -> sigmoid -> lin2 -> log_softmax -> (TB, C) store."""
    x = x_ref[...]                                  # (TB, F) f32
    tb, f = x.shape
    hidden = w1_ref.shape[1]
    c = o_ref.shape[1]                              # true number of classes

    # ---- lin1 ----
    if f <= 8:
        # Tiny contraction: F broadcast-FMAs on the VPU instead of pushing a
        # mostly-zero-padded matmul through the MXU. w1 stays f32 here.
        w1 = w1_ref[...]                            # (F, H) f32
        h = jnp.broadcast_to(b1_ref[...], (tb, hidden)).astype(jnp.float32)
        for k in range(f):                          # static unroll, F is tiny
            h = h + x[:, k:k + 1] * w1[k:k + 1, :]
    else:
        # w1 is pre-cast to bf16 in the wrapper (resident weight, cast once).
        h = jnp.dot(x.astype(jnp.bfloat16), w1_ref[...],
                    preferred_element_type=jnp.float32)
        h = h + b1_ref[...]

    # ---- exact sigmoid (EUP exp; cost hidden in the mem-bound regime) ----
    h = jax.nn.sigmoid(h)

    # ---- lin2: f32 MXU matmul (tiny), classes internally padded to 128 lanes --
    logits = jnp.dot(h, w2_ref[...], preferred_element_type=jnp.float32)
    logits = logits + b2_ref[...]                   # padded classes get -1e30 bias

    # ---- numerically stable log_softmax over classes (padded lanes -> exp()=0) --
    m = jnp.max(logits, axis=1, keepdims=True)
    shifted = logits - m
    lse = jnp.log(jnp.sum(jnp.exp(shifted), axis=1, keepdims=True))
    out = shifted - lse                             # (TB, C_pad)

    # Store only the real classes: (B, C) output, no write amplification.
    o_ref[...] = out[:, :c].astype(o_ref.dtype)


def multiclass_net_forward(x, w1, b1, w2, b2, *, batch_tile=2048):
    """Forward pass of MultiClassNet.

    x : (B, F) f32; w1: (F, H); b1: (1, H) or (H,); w2: (H, C); b2: (1, C) or (C,).
    Returns (B, C) f32 log-probabilities.
    """
    x = jnp.asarray(x, jnp.float32)
    B, F = x.shape
    H = w1.shape[1]
    C = w2.shape[1]

    b1 = jnp.asarray(b1, jnp.float32).reshape(1, H)
    b2 = jnp.asarray(b2, jnp.float32).reshape(1, C)

    # lin1 weights: f32 for the VPU path (F<=8), bf16 for the MXU path (F>8).
    w1 = jnp.asarray(w1, jnp.float32)
    if F > 8:
        w1 = w1.astype(jnp.bfloat16)

    # Internal-only lane padding of the class dim so the lin2 matmul and the
    # log-softmax reduction are lane-dense. Padded columns carry a -1e30 bias
    # so the stable log_softmax ignores them exactly; they are never stored.
    C_pad = max(_LANE, _round_up(C, _LANE))
    w2_p = jnp.zeros((H, C_pad), jnp.float32).at[:, :C].set(
        jnp.asarray(w2, jnp.float32))
    b2_p = jnp.full((1, C_pad), _NEG_BIG, jnp.float32).at[:, :C].set(b2)

    # Batch tiling: weights stay VMEM-resident (constant index_map); x / out
    # tiles are double-buffered by the BlockSpec pipeline. Large TB amortizes
    # the ~0.35us/step overhead; cap at ~B/2 so a v7x megacore gets >=2 tiles.
    TB = max(8, (batch_tile // 8) * 8)
    TB = min(TB, _round_up(B, 8))
    if B > 8:
        TB = min(TB, max(8, _round_up(pl.cdiv(B, 2), 8)))
    grid = (pl.cdiv(B, TB),)                        # ragged last block is fine

    out = pl.pallas_call(
        _mlp_logsoftmax_kernel,
        out_shape=jax.ShapeDtypeStruct((B, C), jnp.float32),
        grid_spec=pltpu.PrefetchScalarGridSpec(
            num_scalar_prefetch=0,
            grid=grid,
            in_specs=[
                pl.BlockSpec((TB, F), lambda i: (i, 0)),        # batch-tiled input
                pl.BlockSpec((F, H), lambda i: (0, 0)),         # resident weights
                pl.BlockSpec((1, H), lambda i: (0, 0)),
                pl.BlockSpec((H, C_pad), lambda i: (0, 0)),
                pl.BlockSpec((1, C_pad), lambda i: (0, 0)),
            ],
            out_specs=pl.BlockSpec((TB, C), lambda i: (i, 0)),  # (B, C) directly
        ),
        compiler_params=pltpu.CompilerParams(
            dimension_semantics=("parallel",),   # shard batch tiles across TCs (v7x)
            vmem_limit_bytes=32 * 1024 * 1024,   # > v5e 16MiB default, < v7x 64MiB
        ),
    )(x, w1, b1, w2_p, b2_p)

    return out


def init_params(key, num_features, num_classes, hidden_features):
    """Deterministic init mimicking nn.Linear's uniform(-1/sqrt(fan_in), 1/sqrt(fan_in))."""
    k1, k2, k3, k4 = jax.random.split(key, 4)
    bound1 = 1.0 / (num_features ** 0.5)
    bound2 = 1.0 / (hidden_features ** 0.5)
    w1 = jax.random.uniform(k1, (num_features, hidden_features), jnp.float32,
                            minval=-bound1, maxval=bound1)
    b1 = jax.random.uniform(k2, (1, hidden_features), jnp.float32,
                            minval=-bound1, maxval=bound1)
    w2 = jax.random.uniform(k3, (hidden_features, num_classes), jnp.float32,
                            minval=-bound2, maxval=bound2)
    b2 = jax.random.uniform(k4, (1, num_classes), jnp.float32,
                            minval=-bound2, maxval=bound2)
    return w1, b1, w2, b2


if __name__ == "__main__":
    NUM_FEATURES = 4
    NUM_CLASSES = 3
    HIDDEN_FEATURES = 32
    BATCH = 16          # small demo; TB is capped at 8 -> exercises a 2-step grid

    key = jax.random.PRNGKey(0)
    kx, kp = jax.random.split(key)
    x = jax.random.normal(kx, (BATCH, NUM_FEATURES), jnp.float32)
    w1, b1, w2, b2 = init_params(kp, NUM_FEATURES, NUM_CLASSES, HIDDEN_FEATURES)

    out = multiclass_net_forward(x, w1, b1, w2, b2)
    out = jax.block_until_ready(out)

    # Reference check in plain f32 JAX (module semantics).
    h_ref = jax.nn.sigmoid(x @ w1 + b1)
    logits_ref = h_ref @ w2 + b2
    ref = jax.nn.log_softmax(logits_ref, axis=1)
    assert out.shape == (BATCH, NUM_CLASSES)
    assert jnp.allclose(out, ref, atol=1e-4, rtol=1e-4), (
        f"max abs err {jnp.max(jnp.abs(out - ref))}")

    print("KERNEL_OK")
</pallas_src>

<mosaic_0001>
module attributes {stable_mosaic.version = 11 : i64} {
  func.func @_mlp_logsoftmax_kernel(%arg0: i32, %arg1: memref<8x4xf32, #tpu.memory_space<vmem>>, %arg2: memref<4x32xf32, #tpu.memory_space<vmem>>, %arg3: memref<1x32xf32, #tpu.memory_space<vmem>>, %arg4: memref<32x128xf32, #tpu.memory_space<vmem>>, %arg5: memref<1x128xf32, #tpu.memory_space<vmem>>, %arg6: memref<8x3xf32, #tpu.memory_space<vmem>>) attributes {dimension_semantics = [#tpu.dimension_semantics<parallel>], iteration_bounds = array<i64: 2>, scalar_prefetch = 0 : i64, scratch_operands = 0 : i64, tpu.core_type = #tpu.core_type<tc>, window_params = [{transform_indices = @transform_0, window_bounds = array<i64: 8, 4>}, {pipeline_mode = #tpu.pipeline_mode<synchronous>, transform_indices = @transform_1, window_bounds = array<i64: 4, 32>}, {pipeline_mode = #tpu.pipeline_mode<synchronous>, transform_indices = @transform_2, window_bounds = array<i64: 1, 32>}, {pipeline_mode = #tpu.pipeline_mode<synchronous>, transform_indices = @transform_3, window_bounds = array<i64: 32, 128>}, {pipeline_mode = #tpu.pipeline_mode<synchronous>, transform_indices = @transform_4, window_bounds = array<i64: 1, 128>}, {transform_indices = @transform_5, window_bounds = array<i64: 8, 3>}]} {
    %c0 = arith.constant 0 : index
    %c0_0 = arith.constant 0 : index
    %0 = vector.load %arg1[%c0, %c0_0] : memref<8x4xf32, #tpu.memory_space<vmem>>, vector<8x4xf32>
    %c0_1 = arith.constant 0 : index
    %c0_2 = arith.constant 0 : index
    %1 = vector.load %arg2[%c0_1, %c0_2] : memref<4x32xf32, #tpu.memory_space<vmem>>, vector<4x32xf32>
    %c0_3 = arith.constant 0 : index
    %c0_4 = arith.constant 0 : index
    %2 = vector.load %arg3[%c0_3, %c0_4] : memref<1x32xf32, #tpu.memory_space<vmem>>, vector<1x32xf32>
    %3 = vector.shape_cast %2 : vector<1x32xf32> to vector<1x32xf32>
    %4 = vector.broadcast %3 : vector<1x32xf32> to vector<8x32xf32>
    %5 = vector.extract_strided_slice %0 {offsets = [0, 0], sizes = [8, 1], strides = [1, 1]} : vector<8x4xf32> to vector<8x1xf32>
    %6 = vector.extract_strided_slice %1 {offsets = [0, 0], sizes = [1, 32], strides = [1, 1]} : vector<4x32xf32> to vector<1x32xf32>
    %7 = vector.broadcast %5 : vector<8x1xf32> to vector<8x32xf32>
    %8 = vector.broadcast %6 : vector<1x32xf32> to vector<8x32xf32>
    %9 = arith.mulf %7, %8 : vector<8x32xf32>
    %10 = arith.addf %4, %9 : vector<8x32xf32>
    %11 = vector.extract_strided_slice %0 {offsets = [0, 1], sizes = [8, 1], strides = [1, 1]} : vector<8x4xf32> to vector<8x1xf32>
    %12 = vector.extract_strided_slice %1 {offsets = [1, 0], sizes = [1, 32], strides = [1, 1]} : vector<4x32xf32> to vector<1x32xf32>
    %13 = vector.broadcast %11 : vector<8x1xf32> to vector<8x32xf32>
    %14 = vector.broadcast %12 : vector<1x32xf32> to vector<8x32xf32>
    %15 = arith.mulf %13, %14 : vector<8x32xf32>
    %16 = arith.addf %10, %15 : vector<8x32xf32>
    %17 = vector.extract_strided_slice %0 {offsets = [0, 2], sizes = [8, 1], strides = [1, 1]} : vector<8x4xf32> to vector<8x1xf32>
    %18 = vector.extract_strided_slice %1 {offsets = [2, 0], sizes = [1, 32], strides = [1, 1]} : vector<4x32xf32> to vector<1x32xf32>
    %19 = vector.broadcast %17 : vector<8x1xf32> to vector<8x32xf32>
    %20 = vector.broadcast %18 : vector<1x32xf32> to vector<8x32xf32>
    %21 = arith.mulf %19, %20 : vector<8x32xf32>
    %22 = arith.addf %16, %21 : vector<8x32xf32>
    %23 = vector.extract_strided_slice %0 {offsets = [0, 3], sizes = [8, 1], strides = [1, 1]} : vector<8x4xf32> to vector<8x1xf32>
    %24 = vector.extract_strided_slice %1 {offsets = [3, 0], sizes = [1, 32], strides = [1, 1]} : vector<4x32xf32> to vector<1x32xf32>
    %25 = vector.broadcast %23 : vector<8x1xf32> to vector<8x32xf32>
    %26 = vector.broadcast %24 : vector<1x32xf32> to vector<8x32xf32>
    %27 = arith.mulf %25, %26 : vector<8x32xf32>
    %28 = arith.addf %22, %27 : vector<8x32xf32>
    %29 = arith.negf %28 : vector<8x32xf32>
    %30 = math.exp %29 : vector<8x32xf32>
    %cst = arith.constant 1.000000e+00 : f32
    %31 = vector.broadcast %cst : f32 to vector<8x32xf32>
    %32 = arith.addf %31, %30 : vector<8x32xf32>
    %33 = arith.divf %31, %32 : vector<8x32xf32>
    %c0_5 = arith.constant 0 : index
    %c0_6 = arith.constant 0 : index
    %34 = vector.load %arg4[%c0_5, %c0_6] : memref<32x128xf32, #tpu.memory_space<vmem>>, vector<32x128xf32>
    %cst_7 = arith.constant dense<0.000000e+00> : vector<8x128xf32>
    %35 = tpu.matmul %33, %34, %cst_7 {dimension_numbers = #tpu.dot_dimension_numbers<[1], [0], [0], [1], [0, 0, 1, 1], [], []>} : vector<8x32xf32>, vector<32x128xf32>, vector<8x128xf32> -> vector<8x128xf32>
    %c0_8 = arith.constant 0 : index
    %c0_9 = arith.constant 0 : index
    %36 = vector.load %arg5[%c0_8, %c0_9] : memref<1x128xf32, #tpu.memory_space<vmem>>, vector<1x128xf32>
    %37 = vector.broadcast %36 : vector<1x128xf32> to vector<8x128xf32>
    %38 = arith.addf %35, %37 : vector<8x128xf32>
    %cst_10 = arith.constant dense<0xFF800000> : vector<8xf32>
    %39 = vector.multi_reduction <maximumf>, %38, %cst_10 [1] : vector<8x128xf32> to vector<8xf32>
    %40 = vector.shape_cast %39 : vector<8xf32> to vector<8x1xf32>
    %41 = vector.broadcast %40 : vector<8x1xf32> to vector<8x128xf32>
    %42 = arith.subf %38, %41 : vector<8x128xf32>
    %43 = math.exp %42 : vector<8x128xf32>
    %cst_11 = arith.constant dense<0.000000e+00> : vector<8xf32>
    %44 = vector.multi_reduction <add>, %43, %cst_11 [1] : vector<8x128xf32> to vector<8xf32>
    %45 = vector.shape_cast %44 : vector<8xf32> to vector<8x1xf32>
    %46 = math.log %45 : vector<8x1xf32>
    %47 = vector.broadcast %46 : vector<8x1xf32> to vector<8x128xf32>
    %48 = arith.subf %42, %47 : vector<8x128xf32>
    %49 = vector.extract_strided_slice %48 {offsets = [0, 0], sizes = [8, 3], strides = [1, 1]} : vector<8x128xf32> to vector<8x3xf32>
    %c0_12 = arith.constant 0 : index
    %c0_13 = arith.constant 0 : index
    %50 = vector.load %arg6[%c0_12, %c0_13] : memref<8x3xf32, #tpu.memory_space<vmem>>, vector<8x3xf32>
    tpu.vector_store %arg6[%c0_12, %c0_13], %49 {strides = array<i32>} : memref<8x3xf32, #tpu.memory_space<vmem>>, vector<8x3xf32>,
    return
  }
  func.func @transform_0(%arg0: i32) -> (i32, i32) {
    %c0_i32 = arith.constant 0 : i32
    %c0_i32_0 = arith.constant 0 : i32
    return %arg0, %c0_i32 : i32, i32
  }
  func.func @transform_1(%arg0: i32) -> (i32, i32) {
    %c0_i32 = arith.constant 0 : i32
    %c0_i32_0 = arith.constant 0 : i32
    %c0_i32_1 = arith.constant 0 : i32
    return %c0_i32, %c0_i32_0 : i32, i32
  }
  func.func @transform_2(%arg0: i32) -> (i32, i32) {
    %c0_i32 = arith.constant 0 : i32
    %c0_i32_0 = arith.constant 0 : i32
    %c0_i32_1 = arith.constant 0 : i32
    return %c0_i32, %c0_i32_0 : i32, i32
  }
  func.func @transform_3(%arg0: i32) -> (i32, i32) {
    %c0_i32 = arith.constant 0 : i32
    %c0_i32_0 = arith.constant 0 : i32
    %c0_i32_1 = arith.constant 0 : i32
    return %c0_i32, %c0_i32_0 : i32, i32
  }
  func.func @transform_4(%arg0: i32) -> (i32, i32) {
    %c0_i32 = arith.constant 0 : i32
    %c0_i32_0 = arith.constant 0 : i32
    %c0_i32_1 = arith.constant 0 : i32
    return %c0_i32, %c0_i32_0 : i32, i32
  }
  func.func @transform_5(%arg0: i32) -> (i32, i32) {
    %c0_i32 = arith.constant 0 : i32
    %c0_i32_0 = arith.constant 0 : i32
    return %arg0, %c0_i32 : i32, i32
  }
}

</mosaic_0001>

<bundles_post_ra>
// kernel: tpu_custom_call.1
= control target key start
LH: loop header
LB: loop body
LE: loop exit
PB: predicated region body
PF: predicated region fallthrough
CT: control target
= control target key end

     0   :  { %10 = vsyncpa [#allocation3], 0  ;;  %s611_s18 = smov 0   ;;  %s683_s0 = inlined_call_operand.vmem [shape: f32[16,4], index: 0, kind: input, shape index: {}]   ;;  %s684_s1 = inlined_call_operand.vmem [shape: f32[4,32], index: 1, kind: input, shape index: {}]   ;;  %s685_s2 = inlined_call_operand.vmem [shape: f32[1,32], index: 2, kind: input, shape index: {}]   ;;  %s686_s3 = inlined_call_operand.hbm [shape: f32[32,128], index: 3, kind: input, shape index: {}]   ;;  %s687_s4 = inlined_call_operand.vmem [shape: f32[1,128], index: 4, kind: input, shape index: {}]   ;;  %s688_s5 = inlined_call_operand.vmem [shape: f32[16,3], index: 5, kind: output, shape index: {}]  }
   0x1 LB: > { %s617_s19 = sadd.s32 4294967295, %s569_s18   ;;  %p455_p0 = scmp.ge.s32.totalorder %s569_s18, 1  ;;  %s569_s18 = sphi %s611_s18, %s16_s18  }
   0x2   : > { %p157_p1 = scmp.lt.s32.totalorder %s569_s18, 3  ;;  %s571_s20 = smov [#allocation2]  }
   0x3   : > { %s175_s21 = sshll.u32 %s571_s20, 4  ;;  %p689_p3 = scmp.eq.s32.totalorder %s617_s19, 0  ;;  %s176_s21 = int_to_ptr.vmem [resolvable:$true] %s175_s21 }
   0x4   : > { %p621_p2 = pnand %p455_p0, %p157_p1  ;;  %s531_s26 = scalar_lea.hbm %s686_s3, 512 }
   0x5   : > { %p532_p6 = scmp.ne.s32.totalorder %s686_s3, %s531_s26  ;;  %p538_p10 = scmp.lt.u32.totalorder %s531_s26, %s686_s3 }
   0x6   : > { %s691_s22 = scalar_select %p621_p2, 1, 0 }
   0x7   : > { %p494_p4 = pneg %p621_p2 }
   0x9   : > { %p630_p5 = pnand %p689_p3, %p494_p4 }
   0xb   : > { %p533_p7 = pneg %p630_p5 }
   0xd   : > { %p534_p8 = pnand %p533_p7, %p532_p6 }
   0xf   : > { %p535_p9 = pneg %p534_p8 }
  0x11   : > { %p540_p11 = pnand %p538_p10, %p535_p9 }
  0x13   : > { %543 = shalt.err (!%p540_p11)
}
  0x14   : > { %s544_s6 = scalar_lea.vmem %s176_s21, 512  ;;  %p552_p1 = scmp.lt.s32.totalorder %s176_s21, %s176_s21 }
  0x15   : > { %p545_p12 = scmp.ne.s32.totalorder %s176_s21, %s544_s6  ;;  %p553_p4 = scmp.lt.s32.totalorder %s544_s6, %s544_s6 }
  0x17   : > { %p547_p13 = pnand %p545_p12, %p533_p7  ;;  %p554_p3 = por %p553_p4, %p552_p1 }
  0x19   : > { %p548_p0 = pneg %p547_p13 }
  0x1b   : > { %p555_p2 = pnand %p554_p3, %p548_p0 }
  0x1d   : > { %558 = shalt.err (!%p555_p2)
}
  0x1e   : > { %s572_s7 = smov 128   ;;  %s573_s8 = smov 8  }
  0x1f   : > { %497 = dma.hbm_to_vmem [thread:$0]  (!%p630_p5), %s686_s3, 512, %s176_s21, [#allocation3], %s572_s7, %s572_s7, %s573_s8  }
  0x20   : > { %p693_p6 = scmp.ne.s32.totalorder %s691_s22, 0 }
  0x21   : > { %p694_p8 = scmp.eq.s32.totalorder (!%p693_p6), %s617_s19, 0 }
  0x22   : > { %201 = sbr.rel (%p693_p6) target bundleno = 744 (0x2e8), region = 40 }
  0x29   : > { %564 = dma.done.wait (%p694_p8), [#allocation3], 512   ;;  %p695_p7 = pmov %p694_p8 }
  0x2a   : > { %p227_p2 = scmp.lt.s32.totalorder %s617_s19, 1  ;;  %v574_v0 = vmov 0   ;;  %v575_v1 = vmov 2   ;;  %v576_v3 = vmov 1   ;;  %v577_v4 = vmov 3   ;;  %v291_v5 = vld [vmem:[#allocation2] sm:$0xff] }
  0x2b   : > { %566 = vsyncadd (%p695_p7), [#allocation3], 4294966784  ;;  %518 = vset.pattern.permute.xlu0 %v574_v0  ;;  %520 = vset.pattern.permute.xlu1 %v575_v1  ;;  %v292_v6 = vld [vmem:[#allocation2 + $0x8] sm:$0xff]  ;;  %v293_v7 = vld [vmem:[#allocation2 + $0x10] sm:$0xff]  ;;  %v578_v8 = vmov 0.0|0.0   ;;  %vm579_vm0 = vmmov 0   ;;  %v249_v13 = vlaneseq }
  0x2c   : > { %s697_s19 = smov (!%p227_p2, %s617_s19), 1  ;;  %484 = vmatprep.subr.bf16.mxu0 %v578_v8  ;;  %v485_v9 = vpack.c.bf16 %v292_v6, %v291_v5  ;;  %v294_v10 = vld [vmem:[#allocation2 + $0x18] sm:$0xff]  ;;  %v580_v11 = vmov 0.0   ;;  %v236_v16 = vld [vmem:[%s684_s1] sm:$0xf]  ;;  %vm302_vm1 = vcmask 261120  }
  0x2d   : > { %s460_s11 = sshll.u32 %s697_s19, 3  ;;  %481 = vmatprep.mubr.msk.f32.mxu0 %vm579_vm0, %v580_v11  ;;  %v488_v12 = vpack.c.bf16 %v294_v10, %v293_v7  ;;  %v250_v14 = vshrl.u32 %v249_v13, 7  ;;  %v462_v25 = vld [vmem:[%s685_s2] ss:$0 sm:$0xff]  ;;  %vm386_vm2 = vcmask 23552  }
  0x2e   : > { %s230_s14 = scalar_lea.vmem %s683_s0, %s460_s11  ;;  %486 = vmatpush3.bf16.msra.mxu0 %v485_v9  ;;  %v464_v41 = vld [vmem:[%s687_s4] ss:$0 sm:$0xff]  ;;  %s234_s25 = scalar_lea.vmem %s688_s5, %s460_s11 }
  0x2f   : > { %v235_v2 = vld [vmem:[%s230_s14] sm:$0xff]  ;;  %487 = vmatprep.subr.bf16.mxu0 %v578_v8  ;;  %v251_v15 = vsub.s32 0, %v250_v14  ;;  %v261_v18 = vsub.s32 1, %v250_v14  ;;  %v271_v20 = vsub.s32 2, %v250_v14  ;;  %v281_v22 = vsub.s32 3, %v250_v14 }
  0x30   : > { %246 = vperm.xlu0 %518, %v235_v2   ;;  %266 = vperm.xlu1 %520, %v235_v2  }
  0x31   : > { %v252_v17 = vrot.slane %v236_v16, %v251_v15  ;;  %v262_v24 = vrot.slane %v236_v16, %v261_v18  ;;  %v272_v26 = vrot.slane %v236_v16, %v271_v20  ;;  %v282_v27 = vrot.slane %v236_v16, %v281_v22 }
  0x32   : > { %489 = vmatpush3.bf16.msra.mxu0 %v488_v12 }
  0x34   : > { %519 = vset.pattern.permute.xlu0 %v576_v3  ;;  %521 = vset.pattern.permute.xlu1 %v577_v4 }
  0x35   : > { %256 = vperm.xlu0 %519, %v235_v2   ;;  %276 = vperm.xlu1 %521, %v235_v2  }
  0x39   : > { %522 = vset.pattern.permute.xlu0 %v577_v4 }
  0xaf   : > { %v247_v19 = vpop.permute.xlu0 %246  ;;  %v267_v21 = vpop.permute.xlu1 %266 }
  0xb0   : > { %v253_v23 = vmul.f32 %v252_v17, %v247_v19  ;;  %v273_v32 = vmul.f32 %v272_v26, %v267_v21 }
  0xb2   : > { %v254_v30 = vadd.f32 %v462_v25, %v253_v23 }
  0xb4   : > { %v257_v28 = vpop.permute.xlu0 %256  ;;  %v277_v29 = vpop.permute.xlu1 %276 }
  0xb5   : > { %v263_v31 = vmul.f32 %v262_v24, %v257_v28  ;;  %v283_v34 = vmul.f32 %v282_v27, %v277_v29 }
  0xb7   : > { %v264_v33 = vadd.f32 %v263_v31, %v254_v30 }
  0xb9   : > { %v274_v35 = vadd.f32 %v273_v32, %v264_v33 }
  0xbb   : > { %v284_v36 = vadd.f32 %v283_v34, %v274_v35 }
  0xbd   : > { %v463_v37 = vmul.f32 -1.442695, %v284_v36 }
  0xbf   : > { %523 = vpow2.f32 %v463_v37 }
  0xc9   : > { %v524_v38 = vpop.eup %523 }
  0xca   : > { %v288_v39 = vadd.f32 1.0, %v524_v38 }
  0xcc   : > { %525 = vrcp.f32 %v288_v39 }
  0xd6   : > { %v526_v40 = vpop.eup %525 }
  0xd7   : > { %482 = vmatmul.mubr.msk.f32.vlgmr.msra.gmra.mrb[0].mxu0 %vm302_vm1, %v526_v40 }
 0x1aa   : > { %v372_v42 = vpop.f32.mrb[0].mxu0 }
 0x1ab   : > { %v373_v43 = vadd.f32 %v464_v41, %v372_v42  ;;  %v483_v44 = vpop.f32.mrb[1].mxu0 }
 0x1ad   : > { %376 = vmax.xlane.f32.xlu1 %v373_v43 }
 0x23a   : > { %v377_v45 = vpop.xlane.xlu1 %376 }
 0x23b   : > { %v378_v46 = vsub.f32 %v373_v43, %v377_v45 }
 0x23d   : > { %v379_v47 = vmul.f32 1.442695, %v378_v46 }
 0x23f   : > { %527 = vpow2.f32 %v379_v47 }
 0x249   : > { %v528_v48 = vpop.eup %527 }
 0x24a   : > { %381 = vadd.xlane.f32.xlu0 %v528_v48 }
 0x2d7   : > { %v382_v49 = vpop.xlane.xlu0 %381 }
 0x2d8   : > { %529 = vlog2.f32 %v382_v49 }
 0x2e2   : > { %v530_v50 = vpop.eup %529 }
 0x2e3   : > { %v384_v51 = vmul.f32 0.6931472, %v530_v50 }
 0x2e5   : > { %v385_v52 = vsub.f32 %v378_v46, %v384_v51 }
 0x2e7   : > { %387 = vst.msk [vmem:[%s234_s25] sm:$0xff] %vm386_vm2, %v385_v52 }
 0x2e8 PF: > { %s16_s18 = sadd.s32 1, %s569_s18  }
 0x2e9   : > { %p13_p3 = scmp.ge.s32.totalorder %s16_s18, 4  }
 0x2eb   :  { %15 = sbr.rel (!%p13_p3) target bundleno = 1 (0x1), region = 75 }
 0x2f2   :  { %407 = vsyncpa [#allocation3], 1 }
 0x2f3   :  { %409 = vsyncpa [#allocation3 + $0x1], 1 }

</bundles_post_ra>
